<compile_context>
chip_gen: v7x
topology: tpu7x:2x2x1
jax: 0.10.0
libtpu: 0.0.40
codegen_flags: <defaults>
</compile_context>

<pallas_src>
import jax
import jax.numpy as jnp
import numpy as np
from jax.experimental import pallas as pl
from jax.experimental.pallas import tpu as pltpu

_LANES = 128  # padded fused-hidden width (>= 2H + 1) and slab lane width


def _round_up(x, m):
    return ((x + m - 1) // m) * m


def _build_kernel(off_w1o, off_w1a, off_w2, off_w3, obs_dim, action_dim, hp):
    """Kernel over one batch tile; all slab offsets are static Python ints."""

    def kernel(obs_ref, act_ref, slab_ref, q_ref):
        obs = obs_ref[...]                                       # (TB, obs_dim)
        act = act_ref[...]                                       # (TB, action_dim)

        b1 = slab_ref[0:1, :]                                    # (1, 128)
        b2 = slab_ref[1:2, :]                                    # (1, 128), lane 2H == 1.0
        w1o = slab_ref[off_w1o:off_w1o + obs_dim, :]             # (obs_dim, 128)
        w1a = slab_ref[off_w1a:off_w1a + action_dim, :]          # (action_dim, 128)
        w2 = slab_ref[off_w2:off_w2 + hp, :]                     # (128, 128) block-diag
        w3 = slab_ref[off_w3:off_w3 + hp, :]                     # (128, 128); row 2H = b3

        # Layer 1: split matmul replaces the obs/action concat (identical math).
        z1 = (jnp.dot(obs, w1o, preferred_element_type=jnp.float32)
              + jnp.dot(act, w1a, preferred_element_type=jnp.float32)
              + b1)
        h1 = jnp.maximum(z1, 0.0)                                # (TB, 128)

        # Layer 2: block-diagonal weight keeps the two heads independent;
        # lane 2H becomes the constant 1.0 "bias feature" for layer 3.
        h2 = jnp.maximum(
            jnp.dot(h1, w2, preferred_element_type=jnp.float32) + b2, 0.0)

        # Layer 3: q1 in lane 0, q2 in lane 1; b3 folded in via the constant-1 lane.
        q = jnp.dot(h2, w3, preferred_element_type=jnp.float32)
        q_ref[...] = q.astype(q_ref.dtype)

    return kernel


def pack_params(params, obs_dim):
    """One-time repack of per-head params into a single lane-padded (R, 128) f32 slab."""
    w1, b1 = params["w1"], params["b1"]      # (2, D, H), (2, 1, H)
    w2, b2 = params["w2"], params["b2"]      # (2, H, H), (2, 1, H)
    w3, b3 = params["w3"], params["b3"]      # (2, H, 1), (2, 1, 1)
    H = w1.shape[-1]
    D = w1.shape[1]
    action_dim = D - obs_dim
    assert 2 * H + 1 <= _LANES, "fused hidden (2H + bias lane) must fit in 128 lanes"
    bias_lane = 2 * H

    # 8-aligned row offsets inside the slab.
    off_w1o = 8
    off_w1a = off_w1o + _round_up(obs_dim, 8)
    off_w2 = off_w1a + _round_up(action_dim, 8)
    off_w3 = off_w2 + _LANES
    rows = _round_up(off_w3 + _LANES, 8)

    slab = jnp.zeros((rows, _LANES), jnp.float32)
    # Bias rows.
    slab = slab.at[0, :H].set(b1[0, 0]).at[0, H:2 * H].set(b1[1, 0])
    slab = slab.at[1, :H].set(b2[0, 0]).at[1, H:2 * H].set(b2[1, 0])
    slab = slab.at[1, bias_lane].set(1.0)            # constant-1 feature for layer 3
    # Layer-1 weights, fused along lanes, rows split into obs / action blocks.
    slab = slab.at[off_w1o:off_w1o + obs_dim, :H].set(w1[0][:obs_dim])
    slab = slab.at[off_w1o:off_w1o + obs_dim, H:2 * H].set(w1[1][:obs_dim])
    slab = slab.at[off_w1a:off_w1a + action_dim, :H].set(w1[0][obs_dim:])
    slab = slab.at[off_w1a:off_w1a + action_dim, H:2 * H].set(w1[1][obs_dim:])
    # Layer-2 block-diagonal weights.
    slab = slab.at[off_w2:off_w2 + H, :H].set(w2[0])
    slab = slab.at[off_w2 + H:off_w2 + 2 * H, H:2 * H].set(w2[1])
    # Layer-3 weights + b3 folded into the constant-1 row.
    slab = slab.at[off_w3:off_w3 + H, 0].set(w3[0][:, 0])
    slab = slab.at[off_w3 + H:off_w3 + 2 * H, 1].set(w3[1][:, 0])
    slab = slab.at[off_w3 + bias_lane, 0].set(b3[0, 0, 0])
    slab = slab.at[off_w3 + bias_lane, 1].set(b3[1, 0, 0])

    layout = dict(off_w1o=off_w1o, off_w1a=off_w1a, off_w2=off_w2, off_w3=off_w3,
                  obs_dim=obs_dim, action_dim=action_dim, rows=rows)
    return {"slab": slab, "layout": layout}


def double_q_critic_forward(obs, action, packed, *, block_b=1024):
    """Returns (q1, q2), each (B, 1), like DoubleQCritic.forward."""
    assert obs.shape[0] == action.shape[0]
    lay = packed["layout"]
    slab = packed["slab"]
    R, HP = slab.shape
    B = obs.shape[0]

    obs = obs.astype(jnp.float32)
    action = action.astype(jnp.float32)

    # Pad batch to a sublane multiple so every block satisfies the (8, 128) rule.
    bp = _round_up(B, 8)
    if bp != B:
        obs = jnp.pad(obs, ((0, bp - B), (0, 0)))
        action = jnp.pad(action, ((0, bp - B), (0, 0)))
    tb = min(bp, _round_up(block_b, 8))
    grid = (pl.cdiv(bp, tb),)

    kernel = _build_kernel(lay["off_w1o"], lay["off_w1a"], lay["off_w2"], lay["off_w3"],
                           lay["obs_dim"], lay["action_dim"], HP)

    q = pl.pallas_call(
        kernel,
        out_shape=jax.ShapeDtypeStruct((bp, HP), jnp.float32),
        grid=grid,
        in_specs=[
            pl.BlockSpec((tb, lay["obs_dim"]), lambda i: (i, 0)),
            pl.BlockSpec((tb, lay["action_dim"]), lambda i: (i, 0)),
            pl.BlockSpec((R, HP), lambda i: (0, 0)),   # weight slab: VMEM-resident
        ],
        out_specs=pl.BlockSpec((tb, HP), lambda i: (i, 0)),
        compiler_params=pltpu.CompilerParams(
            dimension_semantics=("parallel",),          # shard batch across TCs on v7x
            vmem_limit_bytes=32 * 1024 * 1024,          # safe on v5e/v6e/v7x
        ),
    )(obs, action, slab)

    return q[:B, 0:1], q[:B, 1:2]


def init_params(key, in_dim, hidden_dim):
    """Deterministic synthetic init for both Q heads (stacked on axis 0)."""
    ks = jax.random.split(key, 6)
    scale = 0.1
    return {
        "w1": scale * jax.random.normal(ks[0], (2, in_dim, hidden_dim), jnp.float32),
        "b1": scale * jax.random.normal(ks[1], (2, 1, hidden_dim), jnp.float32),
        "w2": scale * jax.random.normal(ks[2], (2, hidden_dim, hidden_dim), jnp.float32),
        "b2": scale * jax.random.normal(ks[3], (2, 1, hidden_dim), jnp.float32),
        "w3": scale * jax.random.normal(ks[4], (2, hidden_dim, 1), jnp.float32),
        "b3": scale * jax.random.normal(ks[5], (2, 1, 1), jnp.float32),
    }


def _reference_forward(obs, action, params):
    """Plain-JAX reference with the original per-head (unfused) math."""
    x = jnp.concatenate([obs, action], axis=-1)
    outs = []
    for i in range(2):
        h = jnp.maximum(x @ params["w1"][i] + params["b1"][i], 0.0)
        h = jnp.maximum(h @ params["w2"][i] + params["b2"][i], 0.0)
        outs.append(h @ params["w3"][i] + params["b3"][i])
    return outs[0], outs[1]


if __name__ == "__main__":
    # Small shapes consistent with the module: obs_dim=24, action_dim=8,
    # hidden_dim=32, hidden_depth=2.
    OBS_DIM, ACT_DIM, HIDDEN = 24, 8, 32

    key = jax.random.PRNGKey(0)
    k_obs, k_act, k_par = jax.random.split(key, 3)
    params = init_params(k_par, OBS_DIM + ACT_DIM, HIDDEN)
    packed = jax.tree.map(jax.block_until_ready, pack_params(params, OBS_DIM))

    def check(batch, block_b):
        ko, ka = jax.random.split(jax.random.fold_in(k_obs, batch), 2)
        obs = jax.random.normal(ko, (batch, OBS_DIM), jnp.float32)
        action = jax.random.normal(ka, (batch, ACT_DIM), jnp.float32)
        q1, q2 = double_q_critic_forward(obs, action, packed, block_b=block_b)
        jax.block_until_ready((q1, q2))
        r1, r2 = _reference_forward(obs, action, params)
        assert q1.shape == (batch, 1) and q2.shape == (batch, 1)
        np.testing.assert_allclose(np.asarray(q1), np.asarray(r1), rtol=1e-5, atol=1e-5)
        np.testing.assert_allclose(np.asarray(q2), np.asarray(r2), rtol=1e-5, atol=1e-5)

    check(8, 1024)     # tiny batch, single grid step
    check(192, 64)     # multi-step grid: resident weight slab + pipelined batch tiles
    check(10, 1024)    # non-multiple-of-8 batch exercises the wrapper padding path

    print("KERNEL_OK")
</pallas_src>

<mosaic_0001>
module attributes {stable_mosaic.version = 11 : i64} {
  func.func @kernel(%arg0: i32, %arg1: memref<8x24xf32, #tpu.memory_space<vmem>>, %arg2: memref<8x8xf32, #tpu.memory_space<vmem>>, %arg3: memref<296x128xf32, #tpu.memory_space<vmem>>, %arg4: memref<8x128xf32, #tpu.memory_space<vmem>>) attributes {dimension_semantics = [#tpu.dimension_semantics<parallel>], iteration_bounds = array<i64: 1>, scalar_prefetch = 0 : i64, scratch_operands = 0 : i64, tpu.core_type = #tpu.core_type<tc>, window_params = [{transform_indices = @transform_0, window_bounds = array<i64: 8, 24>}, {transform_indices = @transform_1, window_bounds = array<i64: 8, 8>}, {pipeline_mode = #tpu.pipeline_mode<synchronous>, transform_indices = @transform_2, window_bounds = array<i64: 296, 128>}, {transform_indices = @transform_3, window_bounds = array<i64: 8, 128>}]} {
    %c0 = arith.constant 0 : index
    %c0_0 = arith.constant 0 : index
    %0 = vector.load %arg1[%c0, %c0_0] : memref<8x24xf32, #tpu.memory_space<vmem>>, vector<8x24xf32>
    %c0_1 = arith.constant 0 : index
    %c0_2 = arith.constant 0 : index
    %1 = vector.load %arg2[%c0_1, %c0_2] : memref<8x8xf32, #tpu.memory_space<vmem>>, vector<8x8xf32>
    %c0_3 = arith.constant 0 : index
    %c0_4 = arith.constant 0 : index
    %2 = vector.load %arg3[%c0_3, %c0_4] : memref<296x128xf32, #tpu.memory_space<vmem>>, vector<1x128xf32>
    %c1 = arith.constant 1 : index
    %c0_5 = arith.constant 0 : index
    %3 = vector.load %arg3[%c1, %c0_5] : memref<296x128xf32, #tpu.memory_space<vmem>>, vector<1x128xf32>
    %c8 = arith.constant 8 : index
    %c0_6 = arith.constant 0 : index
    %4 = vector.load %arg3[%c8, %c0_6] : memref<296x128xf32, #tpu.memory_space<vmem>>, vector<24x128xf32>
    %c32 = arith.constant 32 : index
    %c0_7 = arith.constant 0 : index
    %5 = vector.load %arg3[%c32, %c0_7] : memref<296x128xf32, #tpu.memory_space<vmem>>, vector<8x128xf32>
    %c40 = arith.constant 40 : index
    %c0_8 = arith.constant 0 : index
    %6 = vector.load %arg3[%c40, %c0_8] : memref<296x128xf32, #tpu.memory_space<vmem>>, vector<128x128xf32>
    %c168 = arith.constant 168 : index
    %c0_9 = arith.constant 0 : index
    %7 = vector.load %arg3[%c168, %c0_9] : memref<296x128xf32, #tpu.memory_space<vmem>>, vector<128x128xf32>
    %cst = arith.constant dense<0.000000e+00> : vector<8x128xf32>
    %8 = tpu.matmul %0, %4, %cst {dimension_numbers = #tpu.dot_dimension_numbers<[1], [0], [0], [1], [0, 0, 1, 1], [], []>} : vector<8x24xf32>, vector<24x128xf32>, vector<8x128xf32> -> vector<8x128xf32>
    %cst_10 = arith.constant dense<0.000000e+00> : vector<8x128xf32>
    %9 = tpu.matmul %1, %5, %cst_10 {dimension_numbers = #tpu.dot_dimension_numbers<[1], [0], [0], [1], [0, 0, 1, 1], [], []>} : vector<8x8xf32>, vector<8x128xf32>, vector<8x128xf32> -> vector<8x128xf32>
    %10 = arith.addf %8, %9 : vector<8x128xf32>
    %11 = vector.broadcast %2 : vector<1x128xf32> to vector<8x128xf32>
    %12 = arith.addf %10, %11 : vector<8x128xf32>
    %cst_11 = arith.constant 0.000000e+00 : f32
    %13 = vector.broadcast %cst_11 : f32 to vector<8x128xf32>
    %14 = arith.maximumf %12, %13 : vector<8x128xf32>
    %cst_12 = arith.constant dense<0.000000e+00> : vector<8x128xf32>
    %15 = tpu.matmul %14, %6, %cst_12 {dimension_numbers = #tpu.dot_dimension_numbers<[1], [0], [0], [1], [0, 0, 1, 1], [], []>} : vector<8x128xf32>, vector<128x128xf32>, vector<8x128xf32> -> vector<8x128xf32>
    %16 = vector.broadcast %3 : vector<1x128xf32> to vector<8x128xf32>
    %17 = arith.addf %15, %16 : vector<8x128xf32>
    %cst_13 = arith.constant 0.000000e+00 : f32
    %18 = vector.broadcast %cst_13 : f32 to vector<8x128xf32>
    %19 = arith.maximumf %17, %18 : vector<8x128xf32>
    %cst_14 = arith.constant dense<0.000000e+00> : vector<8x128xf32>
    %20 = tpu.matmul %19, %7, %cst_14 {dimension_numbers = #tpu.dot_dimension_numbers<[1], [0], [0], [1], [0, 0, 1, 1], [], []>} : vector<8x128xf32>, vector<128x128xf32>, vector<8x128xf32> -> vector<8x128xf32>
    %c0_15 = arith.constant 0 : index
    %c0_16 = arith.constant 0 : index
    %21 = vector.load %arg4[%c0_15, %c0_16] : memref<8x128xf32, #tpu.memory_space<vmem>>, vector<8x128xf32>
    tpu.vector_store %arg4[%c0_15, %c0_16], %20 {strides = array<i32>} : memref<8x128xf32, #tpu.memory_space<vmem>>, vector<8x128xf32>,
    return
  }
  func.func @transform_0(%arg0: i32) -> (i32, i32) {
    %c0_i32 = arith.constant 0 : i32
    %c0_i32_0 = arith.constant 0 : i32
    return %arg0, %c0_i32 : i32, i32
  }
  func.func @transform_1(%arg0: i32) -> (i32, i32) {
    %c0_i32 = arith.constant 0 : i32
    %c0_i32_0 = arith.constant 0 : i32
    return %arg0, %c0_i32 : i32, i32
  }
  func.func @transform_2(%arg0: i32) -> (i32, i32) {
    %c0_i32 = arith.constant 0 : i32
    %c0_i32_0 = arith.constant 0 : i32
    %c0_i32_1 = arith.constant 0 : i32
    return %c0_i32, %c0_i32_0 : i32, i32
  }
  func.func @transform_3(%arg0: i32) -> (i32, i32) {
    %c0_i32 = arith.constant 0 : i32
    %c0_i32_0 = arith.constant 0 : i32
    return %arg0, %c0_i32 : i32, i32
  }
}

</mosaic_0001>

<bundles_post_ra>
// kernel: tpu_custom_call.1
= control target key start
LH: loop header
LB: loop body
LE: loop exit
PB: predicated region body
PF: predicated region fallthrough
CT: control target
= control target key end

     0   :  { %8 = vsyncpa [#allocation3], 0  ;;  %s788_s0 = inlined_call_operand.hbm [shape: f32[8,24], index: 0, kind: input, shape index: {}]   ;;  %s789_s1 = inlined_call_operand.hbm [shape: f32[8,8], index: 1, kind: input, shape index: {}]   ;;  %s790_s2 = inlined_call_operand.hbm [shape: f32[296,128], index: 2, kind: input, shape index: {}]   ;;  %s791_s3 = inlined_call_operand.hbm [shape: f32[8,128], index: 3, kind: output, shape index: {}]  }
   0x1   :  { %9 = vsyncpa [#allocation6], 0 }
   0x2   :  { %10 = vsyncpa [#allocation4], 0  ;;  %s690_s12 = smov [#allocation5]   ;;  %s691_s14 = smov [#allocation2]  }
   0x3   :  { %s27_s13 = sshll.u32 %s690_s12, 4  ;;  %s17_s15 = sshll.u32 %s691_s14, 4  ;;  %s28_s13 = int_to_ptr.vmem [resolvable:$true] %s27_s13  ;;  %s18_s15 = int_to_ptr.vmem [resolvable:$true] %s17_s15 }
   0x4   :  { %s596_s18 = scalar_lea.hbm %s789_s1, 128 }
   0x5   :  { %p597_p0 = scmp.ne.s32.totalorder %s789_s1, %s596_s18  ;;  %p600_p1 = scmp.lt.u32.totalorder %s596_s18, %s789_s1 }
   0x7   :  { %p602_p2 = pnand %p600_p1, %p597_p0 }
   0x9   :  { %605 = shalt.err (!%p602_p2)
}
   0xa   :  { %s606_s23 = scalar_lea.vmem %s28_s13, 128  ;;  %p611_p4 = scmp.lt.s32.totalorder %s28_s13, %s28_s13 }
   0xb   :  { %p607_p3 = scmp.ne.s32.totalorder %s28_s13, %s606_s23  ;;  %p612_p5 = scmp.lt.s32.totalorder %s606_s23, %s606_s23 }
   0xd   :  { %p613_p6 = por %p612_p5, %p611_p4 }
   0xf   :  { %p614_p7 = pnand %p613_p6, %p607_p3 }
  0x11   :  { %617 = shalt.err (!%p614_p7)
}
  0x12   :  { %30 = dma.hbm_to_vmem [thread:$0]  %s789_s1, 128, %s28_s13, [#allocation6]  }
  0x13   :  { %s618_s28 = scalar_lea.hbm %s788_s0, 128 }
  0x14   :  { %p619_p8 = scmp.ne.s32.totalorder %s788_s0, %s618_s28  ;;  %p622_p9 = scmp.lt.u32.totalorder %s618_s28, %s788_s0 }
  0x16   :  { %p624_p10 = pnand %p622_p9, %p619_p8 }
  0x18   :  { %627 = shalt.err (!%p624_p10)
}
  0x19   :  { %s628_s6 = scalar_lea.vmem %s18_s15, 128  ;;  %p633_p12 = scmp.lt.s32.totalorder %s18_s15, %s18_s15 }
  0x1a   :  { %p629_p11 = scmp.ne.s32.totalorder %s18_s15, %s628_s6  ;;  %p634_p13 = scmp.lt.s32.totalorder %s628_s6, %s628_s6 }
  0x1c   :  { %p635_p0 = por %p634_p13, %p633_p12 }
  0x1e   :  { %p636_p1 = pnand %p635_p0, %p629_p11 }
  0x20   :  { %639 = shalt.err (!%p636_p1)
}
  0x21   :  { %20 = dma.hbm_to_vmem [thread:$0]  %s788_s0, 128, %s18_s15, [#allocation3]  }
  0x22   :  { %s692_s8 = smov [#allocation7]   ;;  %s640_s12 = scalar_lea.hbm %s790_s2, 4736 }
  0x23   :  { %s36_s9 = sshll.u32 %s692_s8, 4  ;;  %p641_p2 = scmp.ne.s32.totalorder %s790_s2, %s640_s12  ;;  %s37_s9 = int_to_ptr.vmem [resolvable:$true] %s36_s9 }
  0x24   :  { %p644_p3 = scmp.lt.u32.totalorder %s640_s12, %s790_s2 }
  0x26   :  { %p646_p4 = pnand %p644_p3, %p641_p2 }
  0x28   :  { %649 = shalt.err (!%p646_p4)
}
  0x29   :  { %s650_s18 = scalar_lea.vmem %s37_s9, 4736  ;;  %p655_p6 = scmp.lt.s32.totalorder %s37_s9, %s37_s9 }
  0x2a   :  { %p651_p5 = scmp.ne.s32.totalorder %s37_s9, %s650_s18  ;;  %p656_p7 = scmp.lt.s32.totalorder %s650_s18, %s650_s18 }
  0x2c   :  { %p657_p8 = por %p656_p7, %p655_p6 }
  0x2e   :  { %p658_p9 = pnand %p657_p8, %p651_p5 }
  0x30   :  { %661 = shalt.err (!%p658_p9)
}
  0x31   :  { %s693_s0 = smov 128   ;;  %s694_s15 = smov 8  }
  0x32   :  { %42 = dma.hbm_to_vmem [thread:$0]  %s790_s2, 4736, %s37_s9, [#allocation6], %s693_s0, %s693_s0, %s694_s15  }
  0x33   :  { %684 = dma.done.wait [#allocation3], 128  }
  0x34   :  { %685 = vsyncadd [#allocation3], 4294967168 }
  0x35   :  { %686 = dma.done.wait [#allocation6], 4864  }
  0x36   :  { %687 = vsyncadd [#allocation6], 4294962432  ;;  %v695_v0 = vmov 0.0|0.0   ;;  %v696_v1 = vmov 0.0   ;;  %vm697_vm0 = vmmov 0   ;;  %vm92_vm1 = vcmask 64512  }
  0x37   :  { %536 = vmatprep.subr.bf16.mxu1 %v695_v0  ;;  %452 = vmatprep.subr.mxu0 %v696_v1  ;;  %v56_v2 = vld [vmem:[#allocation7 + $0x8] sm:$0xff]  ;;  %v57_v3 = vld [vmem:[#allocation7 + $0x10] sm:$0xff]  ;;  %v59_v4 = vld [vmem:[#allocation7 + $0x20] sm:$0xff]  ;;  %vm166_vm2 = vcmask 195584   ;;  %s698_s2 = smov [#allocation8]  }
  0x38   :  { %454 = vmatprep.mubr.msk.f32.mxu0 %vm697_vm0, %v696_v1  ;;  %463 = vmatprep.mubr.msk.f32.mxu1 %vm697_vm0, %v696_v1  ;;  %v537_v5 = vpack.c.bf16 %v57_v3, %v56_v2  ;;  %v53_v6 = vld [vmem:[#allocation5] sm:$0xff]  ;;  %v60_v7 = vld [vmem:[#allocation7 + $0x28] sm:$0xff]  ;;  %v61_v8 = vld [vmem:[#allocation7 + $0x30] sm:$0xff]  ;;  %s398_s21 = sshll.u32 %s698_s2, 4  ;;  %s399_s21 = int_to_ptr.vmem [resolvable:$true] %s398_s21 }
  0x39   :  { %453 = vmatpush3.msra.mxu0 %v59_v4  ;;  %v62_v9 = vld [vmem:[#allocation7 + $0x38] sm:$0xff]  ;;  %v540_v10 = vpack.c.bf16 %v61_v8, %v60_v7  ;;  %v63_v11 = vld [vmem:[#allocation7 + $0x40] sm:$0xff]  ;;  %v52_v13 = vld [vmem:[#allocation2] sm:$0xff]  ;;  %s662_s22 = scalar_lea.vmem %s399_s21, 128  ;;  %p667_p11 = scmp.lt.s32.totalorder %s399_s21, %s399_s21 }
  0x3a   :  { %455 = vmatmul.mubr.msk.f32.vlgmr.msra.gmra.mrb[0].mxu0 %vm92_vm1, %v53_v6  ;;  %539 = vmatprep.subr.bf16.mxu0 %v695_v0  ;;  %v58_v12 = vld [vmem:[#allocation7 + $0x18] sm:$0xff]  ;;  %v543_v14 = vpack.c.bf16 %v63_v11, %v62_v9  ;;  %v64_v15 = vld [vmem:[#allocation7 + $0x48] sm:$0xff]  ;;  %v65_v16 = vld [vmem:[#allocation7 + $0x50] sm:$0xff]  ;;  %p663_p10 = scmp.ne.s32.totalorder %s399_s21, %s662_s22  ;;  %p668_p12 = scmp.lt.s32.totalorder %s662_s22, %s662_s22 }
  0x3b   :  { %538 = vmatpush3.bf16.msra.mxu1 %v537_v5  ;;  %498 = vmatprep.mubr.msk.f32.mxu0 %vm697_vm0, %v696_v1  ;;  %v546_v17 = vpack.c.bf16 %v65_v16, %v64_v15  ;;  %v66_v18 = vld [vmem:[#allocation7 + $0x58] sm:$0xff]  ;;  %v67_v19 = vld [vmem:[#allocation7 + $0x60] sm:$0xff]  ;;  %v68_v21 = vld [vmem:[#allocation7 + $0x68] sm:$0xff] }
  0x3c   :  { %461 = vmatprep.subr.mxu1 %v696_v1  ;;  %541 = vmatpush3.bf16.msra.mxu0 %v540_v10  ;;  %v549_v20 = vpack.c.bf16 %v67_v19, %v66_v18  ;;  %v69_v22 = vld [vmem:[#allocation7 + $0x70] sm:$0xff]  ;;  %v70_v24 = vld [vmem:[#allocation7 + $0x78] sm:$0xff]  ;;  %v71_v25 = vld [vmem:[#allocation7 + $0x80] sm:$0xff]  ;;  %p669_p13 = por %p668_p12, %p667_p11 }
  0x3d   :  { %542 = vmatprep.subr.bf16.mxu0 %v695_v0  ;;  %v552_v23 = vpack.c.bf16 %v69_v22, %v68_v21  ;;  %v555_v26 = vpack.c.bf16 %v71_v25, %v70_v24  ;;  %v72_v27 = vld [vmem:[#allocation7 + $0x88] sm:$0xff]  ;;  %v73_v28 = vld [vmem:[#allocation7 + $0x90] sm:$0xff]  ;;  %v74_v30 = vld [vmem:[#allocation7 + $0x98] sm:$0xff] }
  0x3e   :  { %v558_v29 = vpack.c.bf16 %v73_v28, %v72_v27  ;;  %v75_v31 = vld [vmem:[#allocation7 + $0xa0] sm:$0xff]  ;;  %v76_v33 = vld [vmem:[#allocation7 + $0xa8] sm:$0xff]  ;;  %v77_v34 = vld [vmem:[#allocation7 + $0xb0] sm:$0xff]  ;;  %p670_p0 = pnand %p669_p13, %p663_p10 }
  0x3f   :  { %462 = vmatpush3.msra.mxu1 %v58_v12  ;;  %v561_v32 = vpack.c.bf16 %v75_v31, %v74_v30  ;;  %v78_v35 = vld [vmem:[#allocation7 + $0xb8] sm:$0xff]  ;;  %v564_v36 = vpack.c.bf16 %v77_v34, %v76_v33  ;;  %v79_v37 = vld [vmem:[#allocation7 + $0xc0] sm:$0xff]  ;;  %v80_v39 = vld [vmem:[#allocation7 + $0xc8] sm:$0xff] }
  0x40   :  { %464 = vmatmul.mubr.msk.f32.vlgmr.msra.gmra.mrb[0].mxu1 %vm166_vm2, %v52_v13  ;;  %563 = vmatprep.subr.bf16.mxu1 %v695_v0  ;;  %v567_v38 = vpack.c.bf16 %v79_v37, %v78_v35  ;;  %v81_v40 = vld [vmem:[#allocation7 + $0xd0] sm:$0xff]  ;;  %v82_v42 = vld [vmem:[#allocation7 + $0xd8] sm:$0xff]  ;;  %v83_v43 = vld [vmem:[#allocation7 + $0xe0] sm:$0xff] }
  0x41   :  { %544 = vmatpush3.bf16.msra.mxu0 %v543_v14  ;;  %533 = vmatprep.mubr.msk.f32.mxu1 %vm697_vm0, %v696_v1  ;;  %v570_v41 = vpack.c.bf16 %v81_v40, %v80_v39  ;;  %v573_v44 = vpack.c.bf16 %v83_v43, %v82_v42  ;;  %v84_v45 = vld [vmem:[#allocation7 + $0xe8] sm:$0xff]  ;;  %v85_v46 = vld [vmem:[#allocation7 + $0xf0] sm:$0xff]  ;;  %v86_v48 = vld [vmem:[#allocation7 + $0xf8] sm:$0xff] }
  0x42   :  { %545 = vmatprep.subr.bf16.mxu0 %v695_v0  ;;  %565 = vmatpush3.bf16.msra.mxu1 %v564_v36  ;;  %v576_v47 = vpack.c.bf16 %v85_v46, %v84_v45  ;;  %v87_v49 = vld [vmem:[#allocation7 + $0x100] sm:$0xff]  ;;  %v88_v51 = vld [vmem:[#allocation7 + $0x108] sm:$0xff]  ;;  %v89_v52 = vld [vmem:[#allocation7 + $0x110] sm:$0xff] }
  0x43   :  { %566 = vmatprep.subr.bf16.mxu1 %v695_v0  ;;  %v579_v50 = vpack.c.bf16 %v87_v49, %v86_v48  ;;  %v582_v53 = vpack.c.bf16 %v89_v52, %v88_v51  ;;  %v410_v56 = vld [vmem:[#allocation7] ss:$0 sm:$0xff]  ;;  %v90_v62 = vld [vmem:[#allocation7 + $0x118] sm:$0xff]  ;;  %v411_v2 = vld [vmem:[#allocation7 + $0x1] ss:$0 sm:$0xff] }
  0x44   :  { %v91_v63 = vld [vmem:[#allocation7 + $0x120] sm:$0xff] }
  0x45   :  { %547 = vmatpush3.bf16.msra.mxu0 %v546_v17  ;;  %v585_v1 = vpack.c.bf16 %v91_v63, %v90_v62 }
  0x46   :  { %548 = vmatprep.subr.bf16.mxu0 %v695_v0  ;;  %568 = vmatpush3.bf16.msra.mxu1 %v567_v38 }
  0x47   :  { %569 = vmatprep.subr.bf16.mxu1 %v695_v0 }
  0x49   :  { %550 = vmatpush3.bf16.msra.mxu0 %v549_v20 }
  0x4a   :  { %551 = vmatprep.subr.bf16.mxu0 %v695_v0  ;;  %571 = vmatpush3.bf16.msra.mxu1 %v570_v41 }
  0x4b   :  { %572 = vmatprep.subr.bf16.mxu1 %v695_v0 }
  0x4d   :  { %553 = vmatpush3.bf16.msra.mxu0 %v552_v23 }
  0x4e   :  { %554 = vmatprep.subr.bf16.mxu0 %v695_v0  ;;  %574 = vmatpush3.bf16.msra.mxu1 %v573_v44 }
  0x4f   :  { %575 = vmatprep.subr.bf16.mxu1 %v695_v0 }
  0x51   :  { %556 = vmatpush3.bf16.msra.mxu0 %v555_v26 }
  0x52   :  { %557 = vmatprep.subr.bf16.mxu0 %v695_v0  ;;  %577 = vmatpush3.bf16.msra.mxu1 %v576_v47 }
  0x53   :  { %578 = vmatprep.subr.bf16.mxu1 %v695_v0 }
  0x55   :  { %559 = vmatpush3.bf16.msra.mxu0 %v558_v29 }
  0x56   :  { %560 = vmatprep.subr.bf16.mxu0 %v695_v0  ;;  %580 = vmatpush3.bf16.msra.mxu1 %v579_v50 }
  0x57   :  { %581 = vmatprep.subr.bf16.mxu1 %v695_v0 }
  0x59   :  { %562 = vmatpush3.bf16.msra.mxu0 %v561_v32 }
  0x5a   :  { %583 = vmatpush3.bf16.msra.mxu1 %v582_v53 }
  0x5b   :  { %584 = vmatprep.subr.bf16.mxu1 %v695_v0 }
  0x5e   :  { %586 = vmatpush3.bf16.msra.mxu1 %v585_v1 }
 0x10d   :  { %v162_v54 = vpop.f32.mrb[0].mxu0 }
 0x10e   :  { %v456_v55 = vpop.f32.mrb[1].mxu0 }
 0x113   :  { %v236_v57 = vpop.f32.mrb[0].mxu1 }
 0x114   :  { %v237_v58 = vadd.f32 %v236_v57, %v162_v54  ;;  %v465_v59 = vpop.f32.mrb[1].mxu1 }
 0x116   :  { %v244_v60 = vadd.f32 %v410_v56, %v237_v58 }
 0x118   :  { %v245_v61 = vmax.f32 %v244_v60, 0.0 }
 0x11a   :  { %499 = vmatmul.mubr.f32.vlgmr.msra.gmra.mrb[2].mxu0 %v245_v61 }
 0x1ed   :  { %v316_v3 = vpop.f32.mrb[2].mxu0 }
 0x1ee   :  { %v317_v4 = vadd.f32 %v411_v2, %v316_v3  ;;  %v500_v5 = vpop.f32.mrb[3].mxu0 }
 0x1f0   :  { %v320_v6 = vmax.f32 %v317_v4, 0.0 }
 0x1f2   :  { %534 = vmatmul.mubr.f32.vlgmr.msra.gmra.mrb[2].mxu1 %v320_v6 }
 0x2c5   :  { %v387_v0 = vpop.f32.mrb[2].mxu1 }
 0x2c6   :  { %391 = vst [vmem:[#allocation8] sm:$0xff] %v387_v0  ;;  %v535_v7 = vpop.f32.mrb[3].mxu1 }
 0x2c7   :  { %673 = shalt.err (!%p670_p0)
}
 0x2c8   :  { %s674_s25 = scalar_lea.hbm %s791_s3, 128 }
 0x2c9   :  { %p675_p1 = scmp.ne.s32.totalorder %s791_s3, %s674_s25  ;;  %p678_p2 = scmp.lt.u32.totalorder %s674_s25, %s791_s3 }
 0x2cb   :  { %p680_p3 = pnand %p678_p2, %p675_p1 }
 0x2cd   :  { %683 = shalt.err (!%p680_p3)
}
 0x2ce   :  { %401 = dma.vmem_to_hbm [thread:$0]  %s399_s21, 128, %s791_s3, [#allocation4]  }
 0x2cf   :  { %688 = dma.done.wait [#allocation4], 128  }
 0x2d0   :  { %689 = vsyncadd [#allocation4], 4294967168 }
 0x2d1   :  { %405 = vsyncpa [#allocation3], 1 }
 0x2d2   :  { %406 = vsyncpa [#allocation6], 1 }
 0x2d3   :  { %407 = vsyncpa [#allocation4], 1 }

</bundles_post_ra>
